<compile_context>
chip_gen: v6e
topology: v6e:2x2x1
jax: 0.10.0
libtpu: 0.0.40
codegen_flags: <defaults>
</compile_context>

<pallas_src>
import jax
import jax.numpy as jnp
from jax.experimental import pallas as pl
from jax.experimental.pallas import tpu as pltpu


def _activation_fn(x):
    # Base-class hook: identity.  Subclasses override with a real activation.
    return x


def _activation_kernel(x_ref, o_ref):
    o_ref[...] = _activation_fn(x_ref[...])


def _choose_lane(n):
    """Largest lane width in {1024,512,256,128} that divides n exactly."""
    for lane in (1024, 512, 256, 128):
        if n % lane == 0:
            return lane
    return None  # irregular flat length -> (1, n) lane-major path


def _choose_block_rows(rows, bytes_per_row, min_sublane, target_block_bytes):
    """Pick a sublane-aligned block row count near the byte target.

    Guarantees >= 2 grid steps whenever rows > min_sublane (v7x megacore can
    then shard the stream across both TensorCores) and prefers an exact
    divisor of `rows` so every block is full (no masked final stores).
    """
    if rows <= min_sublane:
        return rows  # one small block covering the whole slab (full-dim block)

    tgt = (target_block_bytes // bytes_per_row) // min_sublane * min_sublane
    tgt = max(min_sublane, tgt)

    # Cap so that grid >= 2 (block_rows < rows, still a min_sublane multiple).
    cap = (rows - 1) // min_sublane * min_sublane
    tgt = min(tgt, cap) if cap >= min_sublane else min(tgt, rows)

    # Prefer an exact divisor of rows within [tgt/2, tgt] -> all blocks full.
    d = tgt
    lo = max(min_sublane, tgt // 2)
    while d >= lo:
        if rows % d == 0:
            return d
        d -= min_sublane
    return tgt  # ragged final block; Pallas masks it.


def custom_activation_base(x, *, target_block_bytes=4 * 1024 * 1024,
                           in_place=False):
    """Apply the (base/identity) activation elementwise to a tensor of any shape.

    `in_place=True` adds input_output_aliases={0: 0}; the caller must donate
    `x` (jit donate_argnums) or XLA inserts a defensive copy and it becomes a
    pessimization.
    """
    orig_shape = x.shape
    dtype = x.dtype
    n = x.size
    if n == 0:
        return x

    itemsize = jnp.dtype(dtype).itemsize
    # Dtype-aware sublane granularity: 8 for 4-byte, 16 for 2-byte, 32 for 1-byte.
    min_sublane = {4: 8, 2: 16, 1: 32}.get(itemsize, 8)

    flat = x.reshape(-1)
    lane = _choose_lane(n)

    if lane is not None:
        # Common case: lane-dense (rows, lane) slab, free reshape, full tiles.
        rows = n // lane
        x2d = flat.reshape(rows, lane)
        block_rows = _choose_block_rows(rows, lane * itemsize, min_sublane,
                                        target_block_bytes)
        block_shape = (block_rows, lane)
        index_map = lambda i: (i, 0)
        grid = (pl.cdiv(rows, block_rows),)
        out_struct = jax.ShapeDtypeStruct((rows, lane), dtype)
        block_bytes = block_rows * lane * itemsize
    else:
        # Irregular flat length (not a multiple of 128): (1, n) lane-major view.
        # No jnp.pad / output-slice HBM round-trips; Pallas masks the ragged
        # final block's writeback.  Blocks kept modest because a 1-row block
        # may be sublane-padded in VMEM.
        irr_block_bytes = min(target_block_bytes, 512 * 1024)
        block_cols = max(128, (irr_block_bytes // itemsize) // 128 * 128)
        if block_cols >= n:
            block_cols = n  # single full-dim block (legal for any n)
        x2d = flat.reshape(1, n)
        block_shape = (1, block_cols)
        index_map = lambda i: (0, i)
        grid = (pl.cdiv(n, block_cols),)
        out_struct = jax.ShapeDtypeStruct((1, n), dtype)
        block_bytes = block_cols * itemsize * 8  # worst-case sublane padding

    # Double-buffered in+out footprint plus headroom; clamp to [32, 64] MiB so
    # it is explicit on v5e (16 MiB scoped default) yet within v7x's 64 MiB.
    vmem_limit = 4 * block_bytes + (8 << 20)
    vmem_limit = int(min(max(vmem_limit, 32 << 20), 64 << 20))

    out2d = pl.pallas_call(
        _activation_kernel,
        out_shape=out_struct,
        grid_spec=pltpu.PrefetchScalarGridSpec(
            num_scalar_prefetch=0,
            grid=grid,
            in_specs=[pl.BlockSpec(block_shape, index_map)],
            out_specs=pl.BlockSpec(block_shape, index_map),
        ),
        compiler_params=pltpu.CompilerParams(
            dimension_semantics=("parallel",),
            vmem_limit_bytes=vmem_limit,
        ),
        # Pure bandwidth op: 2*n*itemsize bytes, no flops/transcendentals.
        cost_estimate=pl.CostEstimate(
            flops=0, transcendentals=0, bytes_accessed=2 * n * itemsize),
        input_output_aliases={0: 0} if in_place else {},
    )(x2d)

    return out2d.reshape(orig_shape)


if __name__ == "__main__":
    key = jax.random.PRNGKey(0)
    k1, k2, k3, k4 = jax.random.split(key, 4)

    # Small NCHW tensor consistent with the module's conv-style usage.
    x = jax.random.normal(k1, (2, 4, 16, 16), dtype=jnp.float32)
    y = custom_activation_base(x)
    jax.block_until_ready(y)
    assert y.shape == x.shape and y.dtype == x.dtype
    # Base-class default is identity: values must pass through unchanged.
    assert bool(jnp.allclose(y, x))

    # Larger aligned input: exercises the multi-step pipelined path with
    # divisor-aligned full blocks and >= 2 grid steps (v7x megacore split).
    x_big = jax.random.normal(k2, (8, 128, 32, 32), dtype=jnp.float32)
    y_big = custom_activation_base(x_big)
    jax.block_until_ready(y_big)
    assert y_big.shape == x_big.shape and bool(jnp.allclose(y_big, x_big))

    # bf16 input: exercises the dtype-aware sublane multiple (16) path.
    x_bf16 = jax.random.normal(k3, (4, 64, 128), dtype=jnp.bfloat16)
    y_bf16 = custom_activation_base(x_bf16)
    jax.block_until_ready(y_bf16)
    assert y_bf16.shape == x_bf16.shape and y_bf16.dtype == x_bf16.dtype
    assert bool(jnp.all(y_bf16 == x_bf16))

    # Irregular sizes: exercise the pad-free (1, n) path, both the single
    # full-dim block case and the multi-step ragged-final-block case.
    x_odd = jax.random.normal(k4, (3, 5, 7, 11), dtype=jnp.float32)
    y_odd = custom_activation_base(x_odd)
    jax.block_until_ready(y_odd)
    assert y_odd.shape == x_odd.shape and bool(jnp.allclose(y_odd, x_odd))

    x_odd2 = jax.random.normal(k4, (7, 11, 13, 201), dtype=jnp.float32)
    y_odd2 = custom_activation_base(x_odd2)
    jax.block_until_ready(y_odd2)
    assert y_odd2.shape == x_odd2.shape and bool(jnp.allclose(y_odd2, x_odd2))

    print("KERNEL_OK")
</pallas_src>

<mosaic_0001>
module attributes {stable_mosaic.version = 11 : i64} {
  func.func @_activation_kernel(%arg0: i32, %arg1: memref<2x1024xf32, #tpu.memory_space<vmem>>, %arg2: memref<2x1024xf32, #tpu.memory_space<vmem>>) attributes {dimension_semantics = [#tpu.dimension_semantics<parallel>], iteration_bounds = array<i64: 1>, scalar_prefetch = 0 : i64, scratch_operands = 0 : i64, tpu.core_type = #tpu.core_type<tc>, window_params = [{transform_indices = @transform_0, window_bounds = array<i64: 2, 1024>}, {transform_indices = @transform_1, window_bounds = array<i64: 2, 1024>}]} {
    %c0 = arith.constant 0 : index
    %c0_0 = arith.constant 0 : index
    %0 = vector.load %arg1[%c0, %c0_0] : memref<2x1024xf32, #tpu.memory_space<vmem>>, vector<2x1024xf32>
    %c0_1 = arith.constant 0 : index
    %c0_2 = arith.constant 0 : index
    %1 = vector.load %arg2[%c0_1, %c0_2] : memref<2x1024xf32, #tpu.memory_space<vmem>>, vector<2x1024xf32>
    tpu.vector_store %arg2[%c0_1, %c0_2], %0 {strides = array<i32>} : memref<2x1024xf32, #tpu.memory_space<vmem>>, vector<2x1024xf32>,
    return
  }
  func.func @transform_0(%arg0: i32) -> (i32, i32) {
    %c0_i32 = arith.constant 0 : i32
    %c0_i32_0 = arith.constant 0 : i32
    return %arg0, %c0_i32 : i32, i32
  }
  func.func @transform_1(%arg0: i32) -> (i32, i32) {
    %c0_i32 = arith.constant 0 : i32
    %c0_i32_0 = arith.constant 0 : i32
    return %arg0, %c0_i32 : i32, i32
  }
}

</mosaic_0001>

<bundles_post_ra>
// kernel: tpu_custom_call.1
= control target key start
LH: loop header
LB: loop body
LE: loop exit
PB: predicated region body
PF: predicated region fallthrough
CT: control target
= control target key end

     0   :  { %6 = vsyncpa [#allocation3], 0  ;;  %s104_s0 = inlined_call_operand.hbm [shape: f32[2,1024], index: 0, kind: input, shape index: {}]   ;;  %s105_s1 = inlined_call_operand.hbm [shape: f32[2,1024], index: 1, kind: output, shape index: {}]  }
   0x1   :  { %7 = vsyncpa [#allocation4], 0  ;;  %s86_s6 = smov [#allocation2]  }
   0x2   :  { %s14_s7 = sshll.u32 %s86_s6, 4  ;;  %s15_s7 = int_to_ptr.vmem [resolvable:$true] %s14_s7 }
   0x3   :  { %s50_s8 = scalar_lea.vmem %s15_s7, 256  ;;  %p55_p1 = scmp.lt.s32.totalorder %s15_s7, %s15_s7 }
   0x4   :  { %p51_p0 = scmp.ne.s32.totalorder %s15_s7, %s50_s8  ;;  %p56_p2 = scmp.lt.s32.totalorder %s50_s8, %s50_s8 }
   0x6   :  { %p57_p3 = por %p56_p2, %p55_p1 }
   0x8   :  { %p58_p4 = pnand %p57_p3, %p51_p0 }
   0xa   :  { %61 = shalt.err (!%p58_p4)
}
   0xb   :  { %17 = dma.hbm_to_vmem [thread:$0]  %s104_s0, 256, %s15_s7, [#allocation3]  }
   0xc   :  { %82 = dma.done.wait [#allocation3], 256  }
   0xd   :  { %83 = vsyncadd [#allocation3], 4294967040  ;;  %s87_s11 = smov [#allocation5]   ;;  %v21_v0 = vld [vmem:[#allocation2] sm:$0xff]  ;;  %v22_v1 = vld [vmem:[#allocation2 + $0x8] sm:$0xff] }
   0xe   :  { %s31_s12 = sshll.u32 %s87_s11, 4  ;;  %23 = vst [vmem:[#allocation5] sm:$0xff] %v21_v0  ;;  %24 = vst [vmem:[#allocation5 + $0x8] sm:$0xff] %v22_v1  ;;  %s32_s12 = int_to_ptr.vmem [resolvable:$true] %s31_s12 }
   0xf   :  { %s62_s13 = scalar_lea.vmem %s32_s12, 256  ;;  %p67_p6 = scmp.lt.s32.totalorder %s32_s12, %s32_s12 }
  0x10   :  { %p63_p5 = scmp.ne.s32.totalorder %s32_s12, %s62_s13  ;;  %p68_p7 = scmp.lt.s32.totalorder %s62_s13, %s62_s13 }
  0x12   :  { %p69_p8 = por %p68_p7, %p67_p6 }
  0x14   :  { %p70_p9 = pnand %p69_p8, %p63_p5 }
  0x16   :  { %73 = shalt.err (!%p70_p9)
}
  0x17   :  { %34 = dma.vmem_to_hbm [thread:$0]  %s32_s12, 256, %s105_s1, [#allocation4]  }
  0x18   :  { %84 = dma.done.wait [#allocation4], 256  }
  0x19   :  { %85 = vsyncadd [#allocation4], 4294967040 }
  0x1a   :  { %38 = vsyncpa [#allocation3], 1 }
  0x1b   :  { %39 = vsyncpa [#allocation4], 1 }

</bundles_post_ra>
